<compile_context>
chip_gen: v5e
topology: v5e:2x2
jax: 0.10.0
libtpu: 0.0.40
codegen_flags: <defaults>
</compile_context>

<pallas_src>
import jax
import jax.numpy as jnp
from jax.experimental import pallas as pl
from jax.experimental.pallas import tpu as pltpu


def _round_up(v, m):
    return ((v + m - 1) // m) * m


def _mlp_kernel(x_ref, w1_ref, b1_ref, w2t_ref, b2_ref, o_ref):
    """One batch tile: o = relu(x @ w1 + b1) @ w2t + b2."""
    # fc1 on the MXU with f32 accumulation.  x / w1 keep their HBM storage dtype
    # (f32 or bf16) -- no in-kernel cast.
    h = jnp.dot(x_ref[...], w1_ref[...], preferred_element_type=jnp.float32)   # (TB, H)
    h = jnp.maximum(h + b1_ref[...], 0.0)                                      # bias + ReLU (VPU)
    # fc2 also on the MXU (w2 pre-transposed to (H, 1) in the wrapper).  The MXU
    # is nearly idle here, so this is cheaper than a per-row VPU mul + XLU reduce.
    y = jnp.dot(h, w2t_ref[...], preferred_element_type=jnp.float32)           # (TB, 1)
    o_ref[...] = (y + b2_ref[0, 0]).astype(o_ref.dtype)                        # scalar bias (SMEM)


def _pick_batch_tile(B, block_b):
    """Batch tile: multiple of 8 (or == B), big enough to amortize grid-step
    overhead, and sized so the grid has >= 2 steps when B allows (v7x megacore)."""
    block_b = max(8, (block_b // 8) * 8)
    if B <= 8:
        return B                                   # single tile; tb == B is always legal
    half = _round_up(pl.cdiv(B, 2), 8)             # aim for >= 2 grid steps
    return min(block_b, half)


def simple_classifier_forward(x, w1, b1, w2t, b2, *, block_b=32768):
    """x: (B, D); w1: (D, H); b1: (1, H); w2t: (H, 1); b2: (1, 1) -> (B, 1) f32.

    x / w1 may be f32 or bf16 (bf16 halves HBM traffic on this memory-bound
    kernel); b1 / w2t / b2 stay f32 and accumulation is always f32.
    """
    B, D = x.shape
    H = w1.shape[1]
    assert w1.shape == (D, H)
    assert b1.shape == (1, H)
    assert w2t.shape == (H, 1), "kernel is specialized for num_classes == 1"
    assert b2.shape == (1, 1)

    tb = _pick_batch_tile(B, block_b)
    assert tb == B or tb % 8 == 0
    grid = (pl.cdiv(B, tb),)

    # Scoped-VMEM budget: double-buffered x and out tiles + resident weights, with
    # headroom.  v5e's scoped default is only 16 MiB; clamp below v7x's 64 MiB.
    x_bytes = jnp.dtype(x.dtype).itemsize
    w_bytes = jnp.dtype(w1.dtype).itemsize
    needed = (2 * tb * D * x_bytes        # x double buffer
              + 2 * tb * 4                # out double buffer
              + D * H * w_bytes           # resident w1
              + 2 * H * 4)                # resident b1, w2t
    vmem_limit = int(min(56 * 1024 * 1024,
                         max(needed + (8 << 20), 32 * 1024 * 1024)))

    return pl.pallas_call(
        _mlp_kernel,
        out_shape=jax.ShapeDtypeStruct((B, 1), jnp.float32),
        grid_spec=pltpu.PrefetchScalarGridSpec(
            num_scalar_prefetch=0,
            grid=grid,
            in_specs=[
                pl.BlockSpec((tb, D), lambda i: (i, 0)),            # x: tiled over batch
                pl.BlockSpec((D, H), lambda i: (0, 0)),             # w1: VMEM-resident
                pl.BlockSpec((1, H), lambda i: (0, 0)),             # b1: VMEM-resident
                pl.BlockSpec((H, 1), lambda i: (0, 0)),             # w2^T: VMEM-resident
                pl.BlockSpec(memory_space=pltpu.MemorySpace.SMEM),  # b2: scalar in SMEM
            ],
            out_specs=pl.BlockSpec((tb, 1), lambda i: (i, 0)),
        ),
        compiler_params=pltpu.CompilerParams(
            # Independent batch tiles -> shard grid steps across v7x's two TCs.
            dimension_semantics=("parallel",),
            vmem_limit_bytes=vmem_limit),
    )(x, w1, b1, w2t, b2)


if __name__ == "__main__":
    # Shapes implied by the module: input_dim=32, hidden_dim=64, num_classes=1.
    D, H, C = 32, 64, 1

    key = jax.random.PRNGKey(0)
    kx, kw1, kb1, kw2, kb2, kx2 = jax.random.split(key, 6)

    # Deterministic synthetic parameters (Kaiming-uniform-ish scale like nn.Linear).
    lim1 = 1.0 / (D ** 0.5)
    lim2 = 1.0 / (H ** 0.5)
    w1 = jax.random.uniform(kw1, (D, H), minval=-lim1, maxval=lim1, dtype=jnp.float32)
    b1 = jax.random.uniform(kb1, (1, H), minval=-lim1, maxval=lim1, dtype=jnp.float32)
    w2 = jax.random.uniform(kw2, (C, H), minval=-lim2, maxval=lim2, dtype=jnp.float32)
    b2 = jax.random.uniform(kb2, (1, 1), minval=-lim2, maxval=lim2, dtype=jnp.float32)
    w2t = w2.T                                            # (H, 1), pre-transposed once

    def reference(xv):
        h = jnp.maximum(xv @ w1 + b1, 0.0)
        return h @ w2t + b2

    # 1) Module-scale run (B=8, single tile) -- f32 path, same math as PyTorch forward.
    x_small = jax.random.normal(kx, (8, D), dtype=jnp.float32)
    out_small = jax.block_until_ready(simple_classifier_forward(x_small, w1, b1, w2t, b2))
    assert out_small.shape == (8, C)
    assert jnp.allclose(out_small, reference(x_small), atol=1e-4, rtol=1e-4)

    # 2) Multi-tile run (B=256 -> two 128-row tiles, grid >= 2 so both v7x TCs work).
    x_big = jax.random.normal(kx2, (256, D), dtype=jnp.float32)
    out_big = jax.block_until_ready(simple_classifier_forward(x_big, w1, b1, w2t, b2))
    assert out_big.shape == (256, C)
    assert jnp.allclose(out_big, reference(x_big), atol=1e-4, rtol=1e-4)

    # 3) bf16 *storage* fast path: x / w1 cast in HBM (halves input bytes on the
    #    memory-bound path), no in-kernel cast, f32 accumulation.  Opt-in: does not
    #    bit-match the f32 PyTorch module, hence the relaxed tolerance.
    out_bf16 = jax.block_until_ready(
        simple_classifier_forward(x_big.astype(jnp.bfloat16),
                                  w1.astype(jnp.bfloat16), b1, w2t, b2))
    assert out_bf16.shape == (256, C)
    assert jnp.allclose(out_bf16, reference(x_big), atol=1e-1, rtol=1e-1)

    print("KERNEL_OK")
</pallas_src>

<mosaic_0001>
module attributes {stable_mosaic.version = 11 : i64} {
  func.func @_mlp_kernel(%arg0: i32, %arg1: memref<8x32xf32, #tpu.memory_space<vmem>>, %arg2: memref<32x64xf32, #tpu.memory_space<vmem>>, %arg3: memref<1x64xf32, #tpu.memory_space<vmem>>, %arg4: memref<64x1xf32, #tpu.memory_space<vmem>>, %arg5: memref<1x1xf32, #tpu.memory_space<smem>>, %arg6: memref<8x1xf32, #tpu.memory_space<vmem>>) attributes {dimension_semantics = [#tpu.dimension_semantics<parallel>], iteration_bounds = array<i64: 1>, scalar_prefetch = 0 : i64, scratch_operands = 0 : i64, tpu.core_type = #tpu.core_type<tc>, window_params = [{transform_indices = @transform_0, window_bounds = array<i64: 8, 32>}, {pipeline_mode = #tpu.pipeline_mode<synchronous>, transform_indices = @transform_1, window_bounds = array<i64: 32, 64>}, {pipeline_mode = #tpu.pipeline_mode<synchronous>, transform_indices = @transform_2, window_bounds = array<i64: 1, 64>}, {pipeline_mode = #tpu.pipeline_mode<synchronous>, transform_indices = @transform_3, window_bounds = array<i64: 64, 1>}, {transform_indices = @transform_4, window_bounds = array<i64: 1, 1>}, {transform_indices = @transform_5, window_bounds = array<i64: 8, 1>}]} {
    %c0 = arith.constant 0 : index
    %c0_0 = arith.constant 0 : index
    %0 = vector.load %arg1[%c0, %c0_0] : memref<8x32xf32, #tpu.memory_space<vmem>>, vector<8x32xf32>
    %c0_1 = arith.constant 0 : index
    %c0_2 = arith.constant 0 : index
    %1 = vector.load %arg2[%c0_1, %c0_2] : memref<32x64xf32, #tpu.memory_space<vmem>>, vector<32x64xf32>
    %cst = arith.constant dense<0.000000e+00> : vector<8x64xf32>
    %2 = tpu.matmul %0, %1, %cst {dimension_numbers = #tpu.dot_dimension_numbers<[1], [0], [0], [1], [0, 0, 1, 1], [], []>} : vector<8x32xf32>, vector<32x64xf32>, vector<8x64xf32> -> vector<8x64xf32>
    %c0_3 = arith.constant 0 : index
    %c0_4 = arith.constant 0 : index
    %3 = vector.load %arg3[%c0_3, %c0_4] : memref<1x64xf32, #tpu.memory_space<vmem>>, vector<1x64xf32>
    %4 = vector.broadcast %3 : vector<1x64xf32> to vector<8x64xf32>
    %5 = arith.addf %2, %4 : vector<8x64xf32>
    %cst_5 = arith.constant 0.000000e+00 : f32
    %6 = vector.broadcast %cst_5 : f32 to vector<8x64xf32>
    %7 = arith.maximumf %5, %6 : vector<8x64xf32>
    %c0_6 = arith.constant 0 : index
    %c0_7 = arith.constant 0 : index
    %8 = vector.load %arg4[%c0_6, %c0_7] : memref<64x1xf32, #tpu.memory_space<vmem>>, vector<64x1xf32>
    %cst_8 = arith.constant dense<0.000000e+00> : vector<8x1xf32>
    %9 = tpu.matmul %7, %8, %cst_8 {dimension_numbers = #tpu.dot_dimension_numbers<[1], [0], [0], [1], [0, 0, 1, 1], [], []>} : vector<8x64xf32>, vector<64x1xf32>, vector<8x1xf32> -> vector<8x1xf32>
    %c0_9 = arith.constant 0 : index
    %c0_10 = arith.constant 0 : index
    %10 = memref.load %arg5[%c0_9, %c0_10] : memref<1x1xf32, #tpu.memory_space<smem>>
    %11 = vector.broadcast %10 : f32 to vector<8x1xf32>
    %12 = arith.addf %9, %11 : vector<8x1xf32>
    %c0_11 = arith.constant 0 : index
    %c0_12 = arith.constant 0 : index
    %13 = vector.load %arg6[%c0_11, %c0_12] : memref<8x1xf32, #tpu.memory_space<vmem>>, vector<8x1xf32>
    tpu.vector_store %arg6[%c0_11, %c0_12], %12 {strides = array<i32>} : memref<8x1xf32, #tpu.memory_space<vmem>>, vector<8x1xf32>,
    return
  }
  func.func @transform_0(%arg0: i32) -> (i32, i32) {
    %c0_i32 = arith.constant 0 : i32
    %c0_i32_0 = arith.constant 0 : i32
    return %arg0, %c0_i32 : i32, i32
  }
  func.func @transform_1(%arg0: i32) -> (i32, i32) {
    %c0_i32 = arith.constant 0 : i32
    %c0_i32_0 = arith.constant 0 : i32
    %c0_i32_1 = arith.constant 0 : i32
    return %c0_i32, %c0_i32_0 : i32, i32
  }
  func.func @transform_2(%arg0: i32) -> (i32, i32) {
    %c0_i32 = arith.constant 0 : i32
    %c0_i32_0 = arith.constant 0 : i32
    %c0_i32_1 = arith.constant 0 : i32
    return %c0_i32, %c0_i32_0 : i32, i32
  }
  func.func @transform_3(%arg0: i32) -> (i32, i32) {
    %c0_i32 = arith.constant 0 : i32
    %c0_i32_0 = arith.constant 0 : i32
    %c0_i32_1 = arith.constant 0 : i32
    return %c0_i32, %c0_i32_0 : i32, i32
  }
  func.func @transform_4(%arg0: i32) -> (i32, i32) {
    %c0_i32 = arith.constant 0 : i32
    %c0_i32_0 = arith.constant 0 : i32
    %c0_i32_1 = arith.constant 0 : i32
    return %c0_i32, %c0_i32_0 : i32, i32
  }
  func.func @transform_5(%arg0: i32) -> (i32, i32) {
    %c0_i32 = arith.constant 0 : i32
    %c0_i32_0 = arith.constant 0 : i32
    return %arg0, %c0_i32 : i32, i32
  }
}

</mosaic_0001>

<bundles_post_ra>
// kernel: tpu_custom_call.1
= control target key start
LH: loop header
LB: loop body
LE: loop exit
PB: predicated region body
PF: predicated region fallthrough
CT: control target
= control target key end

     0   :  { %vm30_vm0 = vcmask 261120   ;;  %vm65_vm1 = vcmask 523264   ;;  %vm89_vm2 = vcmask 7168   ;;  %s176_s1 = inlined_call_operand.vmem [shape: f32[32,64], index: 1, kind: input, shape index: {}]   ;;  %s177_s3 = inlined_call_operand.vmem [shape: f32[64,1], index: 3, kind: input, shape index: {}]   ;;  %s178_s0 = inlined_call_operand.vmem [shape: f32[8,32], index: 0, kind: input, shape index: {}]   ;;  %s179_s2 = inlined_call_operand.vmem [shape: f32[1,64], index: 2, kind: input, shape index: {}]   ;;  %s180_s4 = inlined_call_operand.<no memory space> [shape: f32[1,1], index: 4, kind: input, shape index: {}]   ;;  %s181_s5 = inlined_call_operand.vmem [shape: f32[8,1], index: 5, kind: output, shape index: {}]  }
   0x1   :  { %v25_v0 = vld [vmem:[%s176_s1 + $0x18] sm:$0xff]  ;;  %v24_v1 = vld [vmem:[%s176_s1 + $0x10] sm:$0xff]  ;;  %v23_v3 = vld [vmem:[%s176_s1 + $0x8] sm:$0xff]  ;;  %v64_v17 = vstv %s180_s4 }
   0x2   :  { %46 = vmatpush.msra.mxu0 %v25_v0  ;;  %v62_v2 = vld [vmem:[%s177_s3 + $0x38] sm:$0xff]  ;;  %v61_v4 = vld [vmem:[%s177_s3 + $0x30] sm:$0xff]  ;;  %v60_v5 = vld [vmem:[%s177_s3 + $0x28] sm:$0xff] }
   0x3   :  { %77 = vmatpush.msra.mxu1 %v62_v2  ;;  %v22_v6 = vld [vmem:[%s176_s1] sm:$0xff]  ;;  %v58_v9 = vld [vmem:[%s177_s3 + $0x18] sm:$0xff]  ;;  %v57_v10 = vld [vmem:[%s177_s3 + $0x10] sm:$0xff] }
   0x4   :  { %47 = vmatpush.msra.mxu0 %v24_v1  ;;  %v21_v7 = vld [vmem:[%s178_s0] sm:$0xff]  ;;  %v56_v11 = vld [vmem:[%s177_s3 + $0x8] sm:$0xff] }
   0x5   :  { %78 = vmatpush.msra.mxu1 %v61_v4  ;;  %v59_v8 = vld [vmem:[%s177_s3 + $0x20] sm:$0xff] }
   0x6   :  { %48 = vmatpush.msra.mxu0 %v23_v3  ;;  %v55_v12 = vld [vmem:[%s177_s3] sm:$0xff] }
   0x7   :  { %79 = vmatpush.msra.mxu1 %v60_v5  ;;  %v97_v13 = vld [vmem:[%s179_s2] ss:$0 sm:$0xff] }
   0x8   :  { %49 = vmatpush.msra.mxu0 %v22_v6 }
   0x9   :  { %95 = vmatmul.msk.f32.vlgmr.msra.gmra.mxu0 %vm30_vm0, %v21_v7  ;;  %80 = vmatpush.msra.mxu1 %v59_v8 }
   0xb   :  { %81 = vmatpush.msra.mxu1 %v58_v9 }
   0xd   :  { %82 = vmatpush.msra.mxu1 %v57_v10 }
   0xf   :  { %83 = vmatpush.msra.mxu1 %v56_v11 }
  0x11   :  { %84 = vmatpush.msra.mxu1 %v55_v12 }
  0x86   :  { %v51_v14 = vpop.f32.mrf.mxu0 }
  0x87   :  { %v52_v15 = vadd.f32 %v97_v13, %v51_v14 }
  0x89   :  { %v54_v16 = vmax.f32 %v52_v15, 0.0 }
  0x8b   :  { %96 = vmatmul.msk.f32.vlgmr.msra.gmra.mxu1 %vm65_vm1, %v54_v16 }
 0x108   :  { %v86_v18 = vpop.f32.mrf.mxu1 }
 0x109   :  { %v87_v19 = vadd.f32 %v86_v18, %v64_v17 }
 0x10b   :  { %90 = vst.msk [vmem:[%s181_s5] sm:$0xff] %vm89_vm2, %v87_v19 }

</bundles_post_ra>
